<compile_context>
chip_gen: v5e
topology: v5e:2x2
jax: 0.10.0
libtpu: 0.0.40
codegen_flags: <defaults>
</compile_context>

<pallas_src>
import functools

import jax
import jax.numpy as jnp
from jax import lax
from jax.experimental import pallas as pl
from jax.experimental.pallas import tpu as pltpu


def _post_act_residual_kernel(x_ref, w_ref, b_ref, o_ref, *,
                              n_linears, scaling_factor):
    """One batch tile of the forward pass.

    x_ref: (TILE_B, F)               x.dtype
    w_ref: (n_linears, F, F)         bf16, already (in, out)
    b_ref: (n_linears, 1, F)         f32
    o_ref: (TILE_B, F)               x.dtype

    w_ref / b_ref have a constant block index (and Buffered(1) when available),
    so they are fetched into VMEM once and stay resident for every batch tile.
    """
    # bf16 operand for the first matmul (MXU-native on all generations).
    h = x_ref[...].astype(jnp.bfloat16)
    acc = None
    # n_linears is a small compile-time constant -> static unroll is optimal.
    for i in range(n_linears):
        acc = jnp.dot(h, w_ref[i], preferred_element_type=jnp.float32)  # MXU
        acc = jnp.maximum(acc + b_ref[i], 0.0)                          # f32 VPU
        h = acc.astype(jnp.bfloat16)
    # Reload the identity tile here (it is already resident in VMEM) instead of
    # keeping an f32 upcast copy live across the whole layer chain.
    out = x_ref[...].astype(jnp.float32) + jnp.float32(scaling_factor) * acc
    o_ref[...] = out.astype(o_ref.dtype)


def _vmem_limit_bytes():
    """~90% of this generation's VMEM (128 MiB v5e/v6e, 64 MiB v7x per TC)."""
    cap = 64 * 2 ** 20
    try:
        cap = int(pltpu.get_tpu_info().vmem_capacity_bytes)
    except Exception:
        pass
    return int(cap * 0.9)


def _pick_tile_b(batch, n_features, itemsize):
    """Pick a batch tile: large (up to 2048 rows), VMEM-capped, >=2 grid steps
    when possible (v7x megacore), minimal zero-padding waste."""
    budget = 8 * 2 ** 20  # x+out, double-buffered: 4 * tile_b * F * itemsize
    cands = [tb for tb in (2048, 1024, 512, 256, 128)
             if 4 * tb * n_features * itemsize <= budget]
    if not cands:
        cands = [128]
    best = None
    for tb in cands:
        if batch >= 2 * tb:                       # keep >= 2 grid steps
            padded = pl.cdiv(batch, tb) * tb
            if best is None or padded < best[0]:  # ties keep the larger tile
                best = (padded, tb)
    if best is not None:
        return best[1]
    smallest = cands[-1]
    if batch > smallest:
        return smallest
    return max(batch, 1)                          # tiny batch: one whole block


def post_activation_residual_block(x, weights, biases, *, scaling_factor=1.0):
    """x: (B, F); weights: (n_linears, F, F) in (in, out) form; biases: (n_linears, 1, F)."""
    n_linears, F, F2 = weights.shape
    B, Fx = x.shape
    assert Fx == F and F2 == F and n_linears >= 1
    assert biases.shape == (n_linears, 1, F)

    # bf16 weights for the MXU (cast once per call; in a real model cast once
    # at parameter load time).  Biases stay f32 for the f32 VPU epilogue.
    w_bf16 = weights.astype(jnp.bfloat16)
    b_f32 = biases.astype(jnp.float32)

    itemsize_x = jnp.dtype(x.dtype).itemsize
    tile_b = _pick_tile_b(B, F, itemsize_x)
    num_tiles = pl.cdiv(B, tile_b)
    grid = (num_tiles,)
    b_pad = num_tiles * tile_b
    x_in = x if b_pad == B else jnp.pad(x, ((0, b_pad - B), (0, 0)))

    flops = 2 * b_pad * F * F * n_linears + 3 * b_pad * F * n_linears + 2 * b_pad * F
    bytes_accessed = (2 * b_pad * F * itemsize_x          # x in + out
                      + n_linears * F * F * 2             # bf16 weights (resident once)
                      + n_linears * F * 4)                # f32 biases

    kernel = functools.partial(_post_act_residual_kernel,
                               n_linears=n_linears,
                               scaling_factor=scaling_factor)

    def run(single_buffer_weights):
        w_kwargs = {}
        if single_buffer_weights:
            # Constant block index -> one resident buffer is enough; halves the
            # weight/bias VMEM footprint vs. the default double-buffering.
            w_kwargs = dict(pipeline_mode=pl.Buffered(buffer_count=1))
        out = pl.pallas_call(
            kernel,
            out_shape=jax.ShapeDtypeStruct((b_pad, F), x.dtype),
            grid=grid,
            in_specs=[
                pl.BlockSpec((tile_b, F), lambda i: (i, 0),
                             memory_space=pltpu.MemorySpace.VMEM),
                pl.BlockSpec((n_linears, F, F), lambda i: (0, 0, 0),
                             memory_space=pltpu.MemorySpace.VMEM, **w_kwargs),
                pl.BlockSpec((n_linears, 1, F), lambda i: (0, 0, 0),
                             memory_space=pltpu.MemorySpace.VMEM, **w_kwargs),
            ],
            out_specs=pl.BlockSpec((tile_b, F), lambda i: (i, 0),
                                   memory_space=pltpu.MemorySpace.VMEM),
            compiler_params=pltpu.CompilerParams(
                dimension_semantics=("parallel",),
                vmem_limit_bytes=_vmem_limit_bytes()),
            cost_estimate=pl.CostEstimate(flops=flops, transcendentals=0,
                                          bytes_accessed=bytes_accessed),
        )(x_in, w_bf16, b_f32)
        return out if b_pad == B else out[:B]

    try:
        return run(True)
    except Exception:
        # Fallback for JAX versions without BlockSpec pipeline_mode support.
        return run(False)


def _reference_f32(x, weights, biases, scaling_factor):
    """Plain-JAX f32 replica of the PyTorch forward (ReLU activation, no BN)."""
    h = x
    for i in range(weights.shape[0]):
        h = jnp.maximum(
            jnp.dot(h, weights[i], precision=lax.Precision.HIGHEST) + biases[i],
            0.0)
    return x + scaling_factor * h


def _reference_bf16(x, weights, biases, scaling_factor):
    """Replica using the kernel's dtype policy (bf16 MXU operands, f32 accum)."""
    w_bf16 = weights.astype(jnp.bfloat16)
    b_f32 = biases.astype(jnp.float32)
    h = x.astype(jnp.float32)
    for i in range(w_bf16.shape[0]):
        h = jnp.dot(h.astype(jnp.bfloat16), w_bf16[i],
                    preferred_element_type=jnp.float32)
        h = jnp.maximum(h + b_f32[i], 0.0)
    return x.astype(jnp.float32) + jnp.float32(scaling_factor) * h


if __name__ == "__main__":
    # Shapes consistent with the module: n_features=128, n_linears=2,
    # scaling_factor=0.5, use_bn=False, activation=ReLU.
    B, F = 256, 128
    n_linears = 2
    scaling_factor = 0.5

    key = jax.random.PRNGKey(0)
    kx, kw, kb = jax.random.split(key, 3)

    x = jax.random.normal(kx, (B, F), dtype=jnp.float32)

    # Deterministic init (uniform in +-1/sqrt(F), like nn.Linear default).
    # PyTorch stores W as (out_f, in_f); we keep the transposed (in_f, out_f).
    bound = 1.0 / jnp.sqrt(jnp.float32(F))
    weights = jax.random.uniform(kw, (n_linears, F, F), jnp.float32,
                                 minval=-bound, maxval=bound)
    biases = jax.random.uniform(kb, (n_linears, 1, F), jnp.float32,
                                minval=-bound, maxval=bound)

    # Multi-tile path (B=256 -> two 128-row grid steps, "parallel").
    out = jax.block_until_ready(
        post_activation_residual_block(x, weights, biases,
                                       scaling_factor=scaling_factor))
    assert out.shape == (B, F)
    assert jnp.allclose(out, _reference_bf16(x, weights, biases, scaling_factor),
                        atol=2e-3, rtol=2e-3), "mismatch vs bf16 reference"
    assert jnp.allclose(out, _reference_f32(x, weights, biases, scaling_factor),
                        atol=3e-2, rtol=3e-2), "mismatch vs f32 reference"

    # Ragged batch (exercises the cdiv grid + zero-padding path).
    x_r = x[:200]
    out_r = jax.block_until_ready(
        post_activation_residual_block(x_r, weights, biases,
                                       scaling_factor=scaling_factor))
    assert out_r.shape == (200, F)
    assert jnp.allclose(out_r,
                        _reference_bf16(x_r, weights, biases, scaling_factor),
                        atol=2e-3, rtol=2e-3), "mismatch vs reference (ragged)"

    # Small batch (single whole-batch block, the module's typical use).
    x_s = x[:8]
    out_s = jax.block_until_ready(
        post_activation_residual_block(x_s, weights, biases,
                                       scaling_factor=scaling_factor))
    assert jnp.allclose(out_s,
                        _reference_bf16(x_s, weights, biases, scaling_factor),
                        atol=2e-3, rtol=2e-3), "mismatch vs reference (small)"

    print("KERNEL_OK")
</pallas_src>

<mosaic_0001>
module attributes {stable_mosaic.version = 11 : i64} {
  func.func @_post_act_residual_kernel(%arg0: i32, %arg1: memref<128x128xf32, #tpu.memory_space<vmem>>, %arg2: memref<2x128x128xbf16, #tpu.memory_space<vmem>>, %arg3: memref<2x1x128xf32, #tpu.memory_space<vmem>>, %arg4: memref<128x128xf32, #tpu.memory_space<vmem>>) attributes {dimension_semantics = [#tpu.dimension_semantics<parallel>], iteration_bounds = array<i64: 2>, scalar_prefetch = 0 : i64, scratch_operands = 0 : i64, tpu.core_type = #tpu.core_type<tc>, window_params = [{transform_indices = @transform_0, window_bounds = array<i64: 128, 128>}, {pipeline_mode = #tpu.pipeline_mode<synchronous>, transform_indices = @transform_1, window_bounds = array<i64: 2, 128, 128>}, {pipeline_mode = #tpu.pipeline_mode<synchronous>, transform_indices = @transform_2, window_bounds = array<i64: 2, 1, 128>}, {transform_indices = @transform_3, window_bounds = array<i64: 128, 128>}]} {
    %c0 = arith.constant 0 : index
    %c0_0 = arith.constant 0 : index
    %0 = vector.load %arg1[%c0, %c0_0] : memref<128x128xf32, #tpu.memory_space<vmem>>, vector<128x128xf32>
    %1 = arith.truncf %0 : vector<128x128xf32> to vector<128x128xbf16>
    %c0_1 = arith.constant 0 : index
    %c0_2 = arith.constant 0 : index
    %c0_3 = arith.constant 0 : index
    %2 = vector.load %arg2[%c0_1, %c0_2, %c0_3] : memref<2x128x128xbf16, #tpu.memory_space<vmem>>, vector<1x128x128xbf16>
    %3 = vector.shape_cast %2 : vector<1x128x128xbf16> to vector<128x128xbf16>
    %cst = arith.constant dense<0.000000e+00> : vector<128x128xf32>
    %4 = tpu.matmul %1, %3, %cst {dimension_numbers = #tpu.dot_dimension_numbers<[1], [0], [0], [1], [0, 0, 1, 1], [], []>} : vector<128x128xbf16>, vector<128x128xbf16>, vector<128x128xf32> -> vector<128x128xf32>
    %c0_4 = arith.constant 0 : index
    %c0_5 = arith.constant 0 : index
    %c0_6 = arith.constant 0 : index
    %5 = vector.load %arg3[%c0_4, %c0_5, %c0_6] : memref<2x1x128xf32, #tpu.memory_space<vmem>>, vector<1x1x128xf32>
    %6 = vector.shape_cast %5 : vector<1x1x128xf32> to vector<1x128xf32>
    %7 = vector.broadcast %6 : vector<1x128xf32> to vector<128x128xf32>
    %8 = arith.addf %4, %7 : vector<128x128xf32>
    %cst_7 = arith.constant 0.000000e+00 : f32
    %9 = vector.broadcast %cst_7 : f32 to vector<128x128xf32>
    %10 = arith.maximumf %8, %9 : vector<128x128xf32>
    %11 = arith.truncf %10 : vector<128x128xf32> to vector<128x128xbf16>
    %c1 = arith.constant 1 : index
    %c0_8 = arith.constant 0 : index
    %c0_9 = arith.constant 0 : index
    %12 = vector.load %arg2[%c1, %c0_8, %c0_9] : memref<2x128x128xbf16, #tpu.memory_space<vmem>>, vector<1x128x128xbf16>
    %13 = vector.shape_cast %12 : vector<1x128x128xbf16> to vector<128x128xbf16>
    %cst_10 = arith.constant dense<0.000000e+00> : vector<128x128xf32>
    %14 = tpu.matmul %11, %13, %cst_10 {dimension_numbers = #tpu.dot_dimension_numbers<[1], [0], [0], [1], [0, 0, 1, 1], [], []>} : vector<128x128xbf16>, vector<128x128xbf16>, vector<128x128xf32> -> vector<128x128xf32>
    %c1_11 = arith.constant 1 : index
    %c0_12 = arith.constant 0 : index
    %c0_13 = arith.constant 0 : index
    %15 = vector.load %arg3[%c1_11, %c0_12, %c0_13] : memref<2x1x128xf32, #tpu.memory_space<vmem>>, vector<1x1x128xf32>
    %16 = vector.shape_cast %15 : vector<1x1x128xf32> to vector<1x128xf32>
    %17 = vector.broadcast %16 : vector<1x128xf32> to vector<128x128xf32>
    %18 = arith.addf %14, %17 : vector<128x128xf32>
    %cst_14 = arith.constant 0.000000e+00 : f32
    %19 = vector.broadcast %cst_14 : f32 to vector<128x128xf32>
    %20 = arith.maximumf %18, %19 : vector<128x128xf32>
    %c0_15 = arith.constant 0 : index
    %c0_16 = arith.constant 0 : index
    %21 = vector.load %arg1[%c0_15, %c0_16] : memref<128x128xf32, #tpu.memory_space<vmem>>, vector<128x128xf32>
    %cst_17 = arith.constant 5.000000e-01 : f32
    %22 = vector.broadcast %cst_17 : f32 to vector<128x128xf32>
    %23 = arith.mulf %22, %20 : vector<128x128xf32>
    %24 = arith.addf %21, %23 : vector<128x128xf32>
    %c0_18 = arith.constant 0 : index
    %c0_19 = arith.constant 0 : index
    %25 = vector.load %arg4[%c0_18, %c0_19] : memref<128x128xf32, #tpu.memory_space<vmem>>, vector<128x128xf32>
    tpu.vector_store %arg4[%c0_18, %c0_19], %24 {strides = array<i32>} : memref<128x128xf32, #tpu.memory_space<vmem>>, vector<128x128xf32>,
    return
  }
  func.func @transform_0(%arg0: i32) -> (i32, i32) {
    %c0_i32 = arith.constant 0 : i32
    %c0_i32_0 = arith.constant 0 : i32
    return %arg0, %c0_i32 : i32, i32
  }
  func.func @transform_1(%arg0: i32) -> (i32, i32, i32) {
    %c0_i32 = arith.constant 0 : i32
    %c0_i32_0 = arith.constant 0 : i32
    %c0_i32_1 = arith.constant 0 : i32
    %c0_i32_2 = arith.constant 0 : i32
    return %c0_i32, %c0_i32_0, %c0_i32_1 : i32, i32, i32
  }
  func.func @transform_2(%arg0: i32) -> (i32, i32, i32) {
    %c0_i32 = arith.constant 0 : i32
    %c0_i32_0 = arith.constant 0 : i32
    %c0_i32_1 = arith.constant 0 : i32
    %c0_i32_2 = arith.constant 0 : i32
    return %c0_i32, %c0_i32_0, %c0_i32_1 : i32, i32, i32
  }
  func.func @transform_3(%arg0: i32) -> (i32, i32) {
    %c0_i32 = arith.constant 0 : i32
    %c0_i32_0 = arith.constant 0 : i32
    return %arg0, %c0_i32 : i32, i32
  }
}

module attributes {stable_mosaic.version = 11 : i64} {
  func.func @_post_act_residual_kernel(%arg0: i32, %arg1: memref<128x128xf32, #tpu.memory_space<vmem>>, %arg2: memref<2x128x128xbf16, #tpu.memory_space<vmem>>, %arg3: memref<2x1x128xf32, #tpu.memory_space<vmem>>, %arg4: memref<128x128xf32, #tpu.memory_space<vmem>>) attributes {dimension_semantics = [#tpu.dimension_semantics<parallel>], iteration_bounds = array<i64: 2>, scalar_prefetch = 0 : i64, scratch_operands = 0 : i64, tpu.core_type = #tpu.core_type<tc>, window_params = [{transform_indices = @transform_0, window_bounds = array<i64: 128, 128>}, {pipeline_mode = #tpu.pipeline_mode<synchronous>, transform_indices = @transform_1, window_bounds = array<i64: 2, 128, 128>}, {pipeline_mode = #tpu.pipeline_mode<synchronous>, transform_indices = @transform_2, window_bounds = array<i64: 2, 1, 128>}, {transform_indices = @transform_3, window_bounds = array<i64: 128, 128>}]} {
    %c0 = arith.constant 0 : index
    %c0_0 = arith.constant 0 : index
    %0 = vector.load %arg1[%c0, %c0_0] : memref<128x128xf32, #tpu.memory_space<vmem>>, vector<128x128xf32>
    %1 = arith.truncf %0 : vector<128x128xf32> to vector<128x128xbf16>
    %c0_1 = arith.constant 0 : index
    %c0_2 = arith.constant 0 : index
    %c0_3 = arith.constant 0 : index
    %2 = vector.load %arg2[%c0_1, %c0_2, %c0_3] : memref<2x128x128xbf16, #tpu.memory_space<vmem>>, vector<1x128x128xbf16>
    %3 = vector.shape_cast %2 : vector<1x128x128xbf16> to vector<128x128xbf16>
    %cst = arith.constant dense<0.000000e+00> : vector<128x128xf32>
    %4 = tpu.matmul %1, %3, %cst {dimension_numbers = #tpu.dot_dimension_numbers<[1], [0], [0], [1], [0, 0, 1, 1], [], []>} : vector<128x128xbf16>, vector<128x128xbf16>, vector<128x128xf32> -> vector<128x128xf32>
    %c0_4 = arith.constant 0 : index
    %c0_5 = arith.constant 0 : index
    %c0_6 = arith.constant 0 : index
    %5 = vector.load %arg3[%c0_4, %c0_5, %c0_6] : memref<2x1x128xf32, #tpu.memory_space<vmem>>, vector<1x1x128xf32>
    %6 = vector.shape_cast %5 : vector<1x1x128xf32> to vector<1x128xf32>
    %7 = vector.broadcast %6 : vector<1x128xf32> to vector<128x128xf32>
    %8 = arith.addf %4, %7 : vector<128x128xf32>
    %cst_7 = arith.constant 0.000000e+00 : f32
    %9 = vector.broadcast %cst_7 : f32 to vector<128x128xf32>
    %10 = arith.maximumf %8, %9 : vector<128x128xf32>
    %11 = arith.truncf %10 : vector<128x128xf32> to vector<128x128xbf16>
    %c1 = arith.constant 1 : index
    %c0_8 = arith.constant 0 : index
    %c0_9 = arith.constant 0 : index
    %12 = vector.load %arg2[%c1, %c0_8, %c0_9] : memref<2x128x128xbf16, #tpu.memory_space<vmem>>, vector<1x128x128xbf16>
    %13 = vector.shape_cast %12 : vector<1x128x128xbf16> to vector<128x128xbf16>
    %cst_10 = arith.constant dense<0.000000e+00> : vector<128x128xf32>
    %14 = tpu.matmul %11, %13, %cst_10 {dimension_numbers = #tpu.dot_dimension_numbers<[1], [0], [0], [1], [0, 0, 1, 1], [], []>} : vector<128x128xbf16>, vector<128x128xbf16>, vector<128x128xf32> -> vector<128x128xf32>
    %c1_11 = arith.constant 1 : index
    %c0_12 = arith.constant 0 : index
    %c0_13 = arith.constant 0 : index
    %15 = vector.load %arg3[%c1_11, %c0_12, %c0_13] : memref<2x1x128xf32, #tpu.memory_space<vmem>>, vector<1x1x128xf32>
    %16 = vector.shape_cast %15 : vector<1x1x128xf32> to vector<1x128xf32>
    %17 = vector.broadcast %16 : vector<1x128xf32> to vector<128x128xf32>
    %18 = arith.addf %14, %17 : vector<128x128xf32>
    %cst_14 = arith.constant 0.000000e+00 : f32
    %19 = vector.broadcast %cst_14 : f32 to vector<128x128xf32>
    %20 = arith.maximumf %18, %19 : vector<128x128xf32>
    %c0_15 = arith.constant 0 : index
    %c0_16 = arith.constant 0 : index
    %21 = vector.load %arg1[%c0_15, %c0_16] : memref<128x128xf32, #tpu.memory_space<vmem>>, vector<128x128xf32>
    %cst_17 = arith.constant 5.000000e-01 : f32
    %22 = vector.broadcast %cst_17 : f32 to vector<128x128xf32>
    %23 = arith.mulf %22, %20 : vector<128x128xf32>
    %24 = arith.addf %21, %23 : vector<128x128xf32>
    %c0_18 = arith.constant 0 : index
    %c0_19 = arith.constant 0 : index
    %25 = vector.load %arg4[%c0_18, %c0_19] : memref<128x128xf32, #tpu.memory_space<vmem>>, vector<128x128xf32>
    tpu.vector_store %arg4[%c0_18, %c0_19], %24 {strides = array<i32>} : memref<128x128xf32, #tpu.memory_space<vmem>>, vector<128x128xf32>,
    return
  }
  func.func @transform_0(%arg0: i32) -> (i32, i32) {
    %c0_i32 = arith.constant 0 : i32
    %c0_i32_0 = arith.constant 0 : i32
    return %arg0, %c0_i32 : i32, i32
  }
  func.func @transform_1(%arg0: i32) -> (i32, i32, i32) {
    %c0_i32 = arith.constant 0 : i32
    %c0_i32_0 = arith.constant 0 : i32
    %c0_i32_1 = arith.constant 0 : i32
    %c0_i32_2 = arith.constant 0 : i32
    return %c0_i32, %c0_i32_0, %c0_i32_1 : i32, i32, i32
  }
  func.func @transform_2(%arg0: i32) -> (i32, i32, i32) {
    %c0_i32 = arith.constant 0 : i32
    %c0_i32_0 = arith.constant 0 : i32
    %c0_i32_1 = arith.constant 0 : i32
    %c0_i32_2 = arith.constant 0 : i32
    return %c0_i32, %c0_i32_0, %c0_i32_1 : i32, i32, i32
  }
  func.func @transform_3(%arg0: i32) -> (i32, i32) {
    %c0_i32 = arith.constant 0 : i32
    %c0_i32_0 = arith.constant 0 : i32
    return %arg0, %c0_i32 : i32, i32
  }
}

</mosaic_0001>

<bundles_post_ra>
// kernel: tpu_custom_call.1
= control target key start
LH: loop header
LB: loop body
LE: loop exit
PB: predicated region body
PF: predicated region fallthrough
CT: control target
= control target key end

     0   :  { %8 = vsyncpa [#allocation3], 0  ;;  %s1331_s0 = inlined_call_operand.hbm [shape: f32[256,128], index: 0, kind: input, shape index: {}]   ;;  %s1332_s1 = inlined_call_operand.hbm [shape: bf16[2,128,128], index: 1, kind: input, shape index: {}]   ;;  %s1333_s2 = inlined_call_operand.hbm [shape: f32[2,1,128], index: 2, kind: input, shape index: {}]   ;;  %s1334_s3 = inlined_call_operand.hbm [shape: f32[256,128], index: 3, kind: output, shape index: {}]  }
   0x1   :  { %10 = vsyncpa [#allocation3 + $0x1], 0 }
   0x2   :  { %11 = vsyncpa [#allocation6], 0 }
   0x3   :  { %12 = vsyncpa [#allocation4], 0 }
   0x4   :  { %14 = vsyncpa [#allocation4 + $0x1], 0  ;;  %s1067_s12 = smov 0   ;;  %s1069_s13 = smov 0  }
   0x5   :  { %s1071_s14 = smov 0   ;;  %s1073_s15 = smov 0  }
   0x6 LB: > { %s1088_s16 = sadd.s32 4294967295, %s1035_s15   ;;  %s682_s17 = sadd.s32 4294967294, %s1035_s15   ;;  %s1035_s15 = sphi %s1073_s15, %s1344_s15   ;;  %s1031_s14 = sphi %s1071_s14, %s1343_s14   ;;  %s1027_s13 = sphi %s1069_s13, %s1342_s13   ;;  %s1023_s12 = sphi %s1067_s12, %s1341_s12  }
   0x7   : > { %p40_p0 = scmp.ne.s32.totalorder %s1027_s13, %s1023_s12  ;;  %p41_p1 = scmp.eq.s32.totalorder %s1088_s16, 0 }
   0x8   : > { %p106_p2 = scmp.eq.s32.totalorder %s1088_s16, 1  ;;  %p112_p3 = scmp.eq.s32.totalorder %s682_s17, 1 }
   0x9   : > { %p1097_p4 = por %p41_p1, %p40_p0  ;;  %p683_p5 = scmp.ge.s32.totalorder %s1035_s15, 1 }
   0xa   : > { %p1102_p6 = por %p112_p3, %p40_p0  ;;  %p119_p7 = scmp.lt.s32.totalorder %s1035_s15, 3 }
   0xb   : > { %s130_s22 = sshll.u32 %s1332_s1, 4  ;;  %s1037_s24 = smov [#allocation5]   ;;  %s131_s22 = int_to_ptr.hbm [resolvable:$true] %s130_s22 }
   0xc   : > { %p1110_p8 = pnand %p683_p5, %p119_p7  ;;  %s132_s25 = sshll.u32 %s1037_s24, 4  ;;  %s133_s25 = int_to_ptr.vmem [resolvable:$true] %s132_s25 }
   0xd   : > { %s144_s28 = sshll.u32 %s1333_s2, 4  ;;  %s1038_s29 = smov 64   ;;  %s145_s28 = int_to_ptr.hbm [resolvable:$true] %s144_s28 }
   0xe   : > { %p810_p9 = pneg %p1110_p8  ;;  %s1039_s30 = smov 4  }
   0xf   : > { %s1040_s4 = smov [#allocation7]   ;;  %s1041_s6 = smov 16  }
  0x10   : > { %p811_p10 = pnand %p810_p9, %p41_p1  ;;  %s146_s5 = sshll.u32 %s1040_s4, 4  ;;  %s147_s5 = int_to_ptr.vmem [resolvable:$true] %s146_s5 }
  0x11   : > { %s1042_s7 = smov 1   ;;  %s1123_s8 = sadd.s32 1, %s1035_s15  }
  0x12   : > { %813 = dma.hbm_to_vmem [thread:$0]  (!%p811_p10), %s131_s22, 2048, %s133_s25, [#allocation6], %s1038_s29, %s1038_s29, %s1039_s30  }
  0x13   : > { %816 = dma.hbm_to_vmem [thread:$0]  (!%p811_p10), %s145_s28, 32, %s147_s5, [#allocation6], %s1041_s6, %s1041_s6, %s1042_s7  }
  0x14   : > { %s24_s9 = ssub.s32 %s1035_s15, %s1123_s8  ;;  %s27_s10 = sadd.s32 1, %s1031_s14 }
  0x15   : > { %p25_p12 = scmp.eq.s32.totalorder %s24_s9, 0  ;;  %p34_p13 = scmp.ne.s32.totalorder %s1031_s14, %s1027_s13 }
  0x16   : > { %p35_p0 = scmp.eq.s32.totalorder %s1035_s15, 0  ;;  %p827_p7 = scmp.lt.s32.totalorder %s1035_s15, 2 }
  0x17   : > { %s1132_s11 = scalar_select %p25_p12, %s1031_s14, %s27_s10  }
  0x18   : > { %p36_p3 = por %p35_p0, %p34_p13  ;;  %p1136_p5 = por %p106_p2, %p34_p13 }
  0x19   : > { %s160_s20 = sand.u32 1, %s1031_s14   ;;  %s764_s22 = sshll.u32 %s1035_s15, 7 }
  0x1a   : > { %s687_s21 = sshll.u32 %s160_s20, 7  ;;  %s169_s26 = scalar_lea.hbm %s1331_s0, %s764_s22 }
  0x1b   : > { %s164_s27 = scalar_lea.vmem [#allocation2], %s687_s21  ;;  %s170_s29 = sshll.u32 %s169_s26, 4  ;;  %s171_s29 = int_to_ptr.hbm [resolvable:$true] %s170_s29 }
  0x1c   : > { %s172_s28 = sshll.u32 %s164_s27, 4  ;;  %p1146_p9 = pnand %p827_p7, %p36_p3  ;;  %s173_s28 = int_to_ptr.vmem [resolvable:$true] %s172_s28 }
  0x1d   : > { %s161_s4 = scalar_lea.sflag [#allocation3], %s160_s20  ;;  %s935_s5 = sshra.s32 %s171_s29, 4  ;;  %s936_s5 = int_to_ptr.hbm [resolvable:$true] %s935_s5 }
  0x1e   : > { %s937_s6 = scalar_lea.hbm %s936_s5, 128  ;;  %p939_p10 = pneg %p1146_p9 }
  0x1f   : > { %p938_p2 = scmp.ne.s32.totalorder %s936_s5, %s937_s6  ;;  %s942_s10 = scalar_lea.hbm %s1331_s0, 256 }
  0x20   : > { %p943_p0 = scmp.lt.s32.totalorder %s936_s5, %s1331_s0  ;;  %p944_p3 = scmp.lt.s32.totalorder %s942_s10, %s937_s6 }
  0x21   : > { %p940_p12 = pnand %p939_p10, %p938_p2 }
  0x22   : > { %p945_p7 = por %p944_p3, %p943_p0 }
  0x23   : > { %p941_p13 = pneg %p940_p12 }
  0x25   : > { %p946_p11 = pnand %p945_p7, %p941_p13 }
  0x27   : > { %949 = shalt.err (!%p946_p11)
}
  0x28   : > { %s1043_s20 = smov 128   ;;  %s1044_s24 = smov 8  }
  0x29   : > { %820 = dma.hbm_to_vmem [thread:$0]  (!%p1146_p9), %s171_s29, 2048, %s173_s28, %s161_s4, %s1043_s20, %s1043_s20, %s1044_s24  }
  0x2a   : > { %184 = sbr.rel (%p1110_p8) target bundleno = 428 (0x1ac), region = 32  ;;  %s1163_s25 = sand.u32 (!%p1110_p8), 1, %s1027_s13  }
  0x2b   : > { %s691_s26 = sshll.u32 (!%p1110_p8), %s1163_s25, 7  ;;  %s187_s27 = scalar_lea.sflag (!%p1110_p8), [#allocation3], %s1163_s25 }
  0x2c   : > { %s1169_s5 = scalar_lea.vmem (!%p1110_p8), [#allocation2], %s691_s26 }
  0x2f   : > { %1010 = dma.done.wait (%p1097_p4), %s187_s27, 2048  }
  0x30   : > { %1012 = vsyncadd (%p1097_p4), %s187_s27, 4294965248 }
  0x31   : > { %1014 = dma.done.wait (%p41_p1), [#allocation6], 2080  }
  0x32   : > { %1016 = vsyncadd (%p41_p1), [#allocation6], 4294965216  ;;  %v772_v0 = vld [vmem:[#allocation5 + $0x38] sm:$0xff]  ;;  %v771_v1 = vld [vmem:[#allocation5 + $0x30] sm:$0xff]  ;;  %s1249_s18 = scalar_lea.vmem [#allocation8], %s691_s26  ;;  %s781_s23 = sshll.u32 %s1088_s16, 7 }
  0x33   : > { %318 = vmatpush.bf16.msra.mxu0 %v772_v0  ;;  %782 = vmatpush.bf16.msra.mxu2 %v772_v0  ;;  %v770_v2 = vld [vmem:[#allocation5 + $0x28] sm:$0xff]  ;;  %v769_v3 = vld [vmem:[#allocation5 + $0x20] sm:$0xff]  ;;  %v768_v4 = vld [vmem:[#allocation5 + $0x18] sm:$0xff]  ;;  %s586_s30 = scalar_lea.hbm %s1334_s3, %s781_s23  ;;  %s587_s4 = sshll.u32 %s1249_s18, 4  ;;  %s588_s4 = int_to_ptr.vmem [resolvable:$true] %s587_s4 }
  0x34   : > { %v767_v5 = vld [vmem:[#allocation5 + $0x10] sm:$0xff]  ;;  %v766_v6 = vld [vmem:[#allocation5 + $0x8] sm:$0xff]  ;;  %v765_v7 = vld [vmem:[#allocation5] sm:$0xff]  ;;  %s589_s6 = sshll.u32 %s586_s30, 4  ;;  %s575_s16 = scalar_lea.sflag [#allocation4], %s1163_s25  ;;  %s590_s6 = int_to_ptr.hbm [resolvable:$true] %s589_s6 }
  0x35   : > { %v1180_v8 = vld [vmem:[%s1169_s5] sm:$0xff]  ;;  %v1183_v9 = vld [vmem:[%s1169_s5 + $0x8] sm:$0xff]  ;;  %v1196_v14 = vld [vmem:[%s1169_s5 + $0x10] sm:$0xff]  ;;  %s979_s7 = sshra.s32 %s590_s6, 4  ;;  %s985_s22 = scalar_lea.hbm %s1334_s3, 256  ;;  %s980_s7 = int_to_ptr.hbm [resolvable:$true] %s979_s7 }
  0x36   : > { %v1186_v10 = vld [vmem:[%s1169_s5 + $0x40] sm:$0xff]  ;;  %v1189_v11 = vld [vmem:[%s1169_s5 + $0x48] sm:$0xff]  ;;  %v242_v12 = vpack.c.bf16 %v1183_v9, %v1180_v8  ;;  %v1199_v15 = vld [vmem:[%s1169_s5 + $0x18] sm:$0xff]  ;;  %s981_s9 = scalar_lea.hbm %s980_s7, 128  ;;  %p986_p11 = scmp.lt.s32.totalorder %s980_s7, %s1334_s3 }
  0x37   : > { %319 = vmatpush.bf16.msra.mxu0 %v771_v1  ;;  %783 = vmatpush.bf16.msra.mxu2 %v771_v1  ;;  %v246_v13 = vpack.c.bf16 %v1189_v11, %v1186_v10  ;;  %v1202_v16 = vld [vmem:[%s1169_s5 + $0x50] sm:$0xff]  ;;  %v1205_v17 = vld [vmem:[%s1169_s5 + $0x58] sm:$0xff]  ;;  %v243_v18 = vpack.c.bf16 %v1199_v15, %v1196_v14  ;;  %v778_v22 = vld [vmem:[#allocation5 + $0x68] sm:$0xff]  ;;  %p982_p1 = scmp.ne.s32.totalorder %s980_s7, %s981_s9  ;;  %p987_p9 = scmp.lt.s32.totalorder %s985_s22, %s981_s9 }
  0x38   : > { %v247_v19 = vpack.c.bf16 %v1205_v17, %v1202_v16  ;;  %v780_v20 = vld [vmem:[#allocation5 + $0x78] sm:$0xff]  ;;  %v779_v21 = vld [vmem:[#allocation5 + $0x70] sm:$0xff]  ;;  %v1212_v23 = vld [vmem:[%s1169_s5 + $0x20] sm:$0xff] }
  0x39   : > { %461 = vmatpush.bf16.msra.mxu1 %v780_v20  ;;  %790 = vmatpush.bf16.msra.mxu3 %v780_v20  ;;  %v1215_v24 = vld [vmem:[%s1169_s5 + $0x28] sm:$0xff]  ;;  %v1218_v25 = vld [vmem:[%s1169_s5 + $0x60] sm:$0xff]  ;;  %v1228_v30 = vld [vmem:[%s1169_s5 + $0x30] sm:$0xff]  ;;  %p983_p4 = pnand %p982_p1, %p1136_p5  ;;  %p988_p2 = por %p987_p9, %p986_p11 }
  0x3a   : > { %v1221_v26 = vld [vmem:[%s1169_s5 + $0x68] sm:$0xff]  ;;  %v777_v27 = vld [vmem:[#allocation5 + $0x60] sm:$0xff]  ;;  %v244_v28 = vpack.c.bf16 %v1215_v24, %v1212_v23  ;;  %v1231_v31 = vld [vmem:[%s1169_s5 + $0x38] sm:$0xff] }
  0x3b   : > { %320 = vmatpush.bf16.msra.mxu0 %v770_v2  ;;  %784 = vmatpush.bf16.msra.mxu2 %v770_v2  ;;  %v248_v29 = vpack.c.bf16 %v1221_v26, %v1218_v25  ;;  %v1234_v32 = vld [vmem:[%s1169_s5 + $0x70] sm:$0xff]  ;;  %v1237_v33 = vld [vmem:[%s1169_s5 + $0x78] sm:$0xff]  ;;  %v245_v34 = vpack.c.bf16 %v1231_v31, %v1228_v30  ;;  %v774_v38 = vld [vmem:[#allocation5 + $0x48] sm:$0xff]  ;;  %p984_p8 = pneg %p983_p4 }
  0x3c   : > { %v249_v35 = vpack.c.bf16 %v1237_v33, %v1234_v32  ;;  %v776_v36 = vld [vmem:[#allocation5 + $0x58] sm:$0xff]  ;;  %v775_v37 = vld [vmem:[#allocation5 + $0x50] sm:$0xff]  ;;  %v773_v39 = vld [vmem:[#allocation5 + $0x40] sm:$0xff] }
  0x3d   : > { %462 = vmatpush.bf16.msra.mxu1 %v779_v21  ;;  %791 = vmatpush.bf16.msra.mxu3 %v779_v21  ;;  %v873_v41 = vld [vmem:[#allocation7] ss:$0 sm:$0xff]  ;;  %p989_p10 = pnand %p988_p2, %p984_p8 }
  0x3f   : > { %321 = vmatpush.bf16.msra.mxu0 %v769_v3  ;;  %785 = vmatpush.bf16.msra.mxu2 %v769_v3 }
  0x41   : > { %463 = vmatpush.bf16.msra.mxu1 %v778_v22  ;;  %792 = vmatpush.bf16.msra.mxu3 %v778_v22 }
  0x43   : > { %322 = vmatpush.bf16.msra.mxu0 %v768_v4  ;;  %786 = vmatpush.bf16.msra.mxu2 %v768_v4 }
  0x45   : > { %464 = vmatpush.bf16.msra.mxu1 %v777_v27  ;;  %793 = vmatpush.bf16.msra.mxu3 %v777_v27 }
  0x47   : > { %323 = vmatpush.bf16.msra.mxu0 %v767_v5  ;;  %787 = vmatpush.bf16.msra.mxu2 %v767_v5 }
  0x49   : > { %465 = vmatpush.bf16.msra.mxu1 %v776_v36  ;;  %794 = vmatpush.bf16.msra.mxu3 %v776_v36 }
  0x4b   : > { %324 = vmatpush.bf16.msra.mxu0 %v766_v6  ;;  %788 = vmatpush.bf16.msra.mxu2 %v766_v6 }
  0x4d   : > { %466 = vmatpush.bf16.msra.mxu1 %v775_v37  ;;  %795 = vmatpush.bf16.msra.mxu3 %v775_v37 }
  0x4f   : > { %325 = vmatpush.bf16.msra.mxu0 %v765_v7  ;;  %789 = vmatpush.bf16.msra.mxu2 %v765_v7 }
  0x51   : > { %467 = vmatpush.bf16.msra.mxu1 %v774_v38  ;;  %796 = vmatpush.bf16.msra.mxu3 %v774_v38 }
  0x52   : > { %326 = vmatmul.bf16.vlgmr.msra.gmra.mxu0 %v242_v12  ;;  %346 = vmatmul.bf16.vlgmr.msra.gmra.mxu2 %v246_v13 }
  0x55   : > { %468 = vmatpush.bf16.msra.mxu1 %v773_v39  ;;  %797 = vmatpush.bf16.msra.mxu3 %v773_v39 }
  0x62   : > { %331 = vmatmul.bf16.gmra.mxu0 %v243_v18  ;;  %351 = vmatmul.bf16.gmra.mxu2 %v247_v19 }
  0x72   : > { %336 = vmatmul.bf16.gmra.mxu0 %v244_v28  ;;  %356 = vmatmul.bf16.gmra.mxu2 %v248_v29 }
  0x82   : > { %341 = vmatmul.bf16.gmra.mxu0 %v245_v34  ;;  %361 = vmatmul.bf16.gmra.mxu2 %v249_v35 }
  0xcf   : > { %v327_v40 = vpop.f32.mrf.mxu0 }
  0xd0   : > { %v328_v42 = vadd.f32 %v873_v41, %v327_v40 }
  0xd2   : > { %v367_v45 = vmax.f32 %v328_v42, 0.0 }
  0xd5   : > { %v347_v43 = vpop.f32.mrf.mxu2 }
  0xd6   : > { %v348_v48 = vadd.f32 %v873_v41, %v347_v43 }
  0xd7   : > { %v329_v44 = vpop.f32.mrf.mxu0 }
  0xd8   : > { %v330_v46 = vadd.f32 %v873_v41, %v329_v44  ;;  %v375_v53 = vmax.f32 %v348_v48, 0.0 }
  0xda   : > { %v368_v47 = vmax.f32 %v330_v46, 0.0 }
  0xdc   : > { %v383_v49 = vpack.c.bf16 %v368_v47, %v367_v45 }
  0xdd   : > { %v349_v50 = vpop.f32.mrf.mxu2 }
  0xde   : > { %v350_v51 = vadd.f32 %v873_v41, %v349_v50  ;;  %469 = vmatmul.bf16.vlgmr.msra.gmra.mxu1 %v383_v49  ;;  %v1243_v50 = vld [vmem:[#allocation7 + $0x1] ss:$0 sm:$0xff] }
  0xdf   : > { %v332_v52 = vpop.f32.mrf.mxu0 }
  0xe0   : > { %v376_v54 = vmax.f32 %v350_v51, 0.0  ;;  %v333_v56 = vadd.f32 %v873_v41, %v332_v52 }
  0xe2   : > { %v387_v55 = vpack.c.bf16 %v376_v54, %v375_v53  ;;  %v369_v59 = vmax.f32 %v333_v56, 0.0 }
  0xe4   : > { %489 = vmatmul.bf16.vlgmr.msra.gmra.mxu3 %v387_v55 }
  0xe5   : > { %v352_v57 = vpop.f32.mrf.mxu2 }
  0xe6   : > { %v353_v62 = vadd.f32 %v873_v41, %v352_v57 }
  0xe7   : > { %v334_v58 = vpop.f32.mrf.mxu0 }
  0xe8   : > { %v335_v60 = vadd.f32 %v873_v41, %v334_v58  ;;  %v377_v3 = vmax.f32 %v353_v62, 0.0 }
  0xea   : > { %v370_v61 = vmax.f32 %v335_v60, 0.0 }
  0xec   : > { %v384_v63 = vpack.c.bf16 %v370_v61, %v369_v59 }
  0xed   : > { %v354_v0 = vpop.f32.mrf.mxu2 }
  0xee   : > { %v355_v1 = vadd.f32 %v873_v41, %v354_v0  ;;  %474 = vmatmul.bf16.gmra.mxu1 %v384_v63 }
  0xef   : > { %v337_v2 = vpop.f32.mrf.mxu0 }
  0xf0   : > { %v378_v4 = vmax.f32 %v355_v1, 0.0  ;;  %v338_v6 = vadd.f32 %v873_v41, %v337_v2 }
  0xf2   : > { %v388_v5 = vpack.c.bf16 %v378_v4, %v377_v3  ;;  %v371_v13 = vmax.f32 %v338_v6, 0.0 }
  0xf4   : > { %494 = vmatmul.bf16.gmra.mxu3 %v388_v5 }
  0xf5   : > { %v357_v7 = vpop.f32.mrf.mxu2 }
  0xf6   : > { %v358_v20 = vadd.f32 %v873_v41, %v357_v7 }
  0xf7   : > { %v339_v12 = vpop.f32.mrf.mxu0 }
  0xf8   : > { %v340_v18 = vadd.f32 %v873_v41, %v339_v12  ;;  %v379_v29 = vmax.f32 %v358_v20, 0.0 }
  0xfa   : > { %v372_v19 = vmax.f32 %v340_v18, 0.0 }
  0xfc   : > { %v385_v21 = vpack.c.bf16 %v372_v19, %v371_v13 }
  0xfd   : > { %v359_v22 = vpop.f32.mrf.mxu2 }
  0xfe   : > { %v360_v27 = vadd.f32 %v873_v41, %v359_v22  ;;  %479 = vmatmul.bf16.gmra.mxu1 %v385_v21 }
  0xff   : > { %v342_v28 = vpop.f32.mrf.mxu0 }
 0x100   : > { %v380_v34 = vmax.f32 %v360_v27, 0.0  ;;  %v343_v36 = vadd.f32 %v873_v41, %v342_v28 }
 0x102   : > { %v389_v35 = vpack.c.bf16 %v380_v34, %v379_v29  ;;  %v373_v39 = vmax.f32 %v343_v36, 0.0 }
 0x104   : > { %499 = vmatmul.bf16.gmra.mxu3 %v389_v35 }
 0x105   : > { %v362_v37 = vpop.f32.mrf.mxu2 }
 0x106   : > { %v363_v43 = vadd.f32 %v873_v41, %v362_v37 }
 0x107   : > { %v344_v38 = vpop.f32.mrf.mxu0 }
 0x108   : > { %v345_v40 = vadd.f32 %v873_v41, %v344_v38  ;;  %v381_v47 = vmax.f32 %v363_v43, 0.0 }
 0x10a   : > { %v374_v42 = vmax.f32 %v345_v40, 0.0 }
 0x10c   : > { %v386_v44 = vpack.c.bf16 %v374_v42, %v373_v39 }
 0x10d   : > { %v364_v45 = vpop.f32.mrf.mxu2 }
 0x10e   : > { %v365_v46 = vadd.f32 %v873_v41, %v364_v45  ;;  %484 = vmatmul.bf16.gmra.mxu1 %v386_v44 }
 0x110   : > { %v382_v48 = vmax.f32 %v365_v46, 0.0 }
 0x112   : > { %v390_v49 = vpack.c.bf16 %v382_v48, %v381_v47 }
 0x114   : > { %504 = vmatmul.bf16.gmra.mxu3 %v390_v49 }
 0x15b   : > { %v470_v51 = vpop.f32.mrf.mxu1 }
 0x15c   : > { %v471_v52 = vadd.f32 %v1243_v50, %v470_v51 }
 0x15e   : > { %v510_v53 = vmax.f32 %v471_v52, 0.0 }
 0x160   : > { %v526_v54 = vmul.f32 0.5, %v510_v53 }
 0x162   : > { %v542_v55 = vadd.f32 %v526_v54, %v1180_v8 }
 0x163   : > { %v472_v56 = vpop.f32.mrf.mxu1 }
 0x164   : > { %558 = vst [vmem:[%s1249_s18] sm:$0xff] %v542_v55  ;;  %v473_v41 = vadd.f32 %v1243_v50, %v472_v56 }
 0x166   : > { %v511_v57 = vmax.f32 %v473_v41, 0.0 }
 0x167   : > { %v490_v58 = vpop.f32.mrf.mxu3 }
 0x168   : > { %v527_v59 = vmul.f32 0.5, %v511_v57  ;;  %v491_v60 = vadd.f32 %v1243_v50, %v490_v58 }
 0x16a   : > { %v543_v61 = vadd.f32 %v527_v59, %v1183_v9  ;;  %v518_v62 = vmax.f32 %v491_v60, 0.0 }
 0x16b   : > { %v475_v8 = vpop.f32.mrf.mxu1 }
 0x16c   : > { %559 = vst [vmem:[%s1249_s18 + $0x8] sm:$0xff] %v543_v61  ;;  %v534_v63 = vmul.f32 0.5, %v518_v62  ;;  %v476_v0 = vadd.f32 %v1243_v50, %v475_v8 }
 0x16e   : > { %v550_v1 = vadd.f32 %v534_v63, %v1186_v10  ;;  %v512_v2 = vmax.f32 %v476_v0, 0.0 }
 0x16f   : > { %v492_v3 = vpop.f32.mrf.mxu3 }
 0x170   : > { %566 = vst [vmem:[%s1249_s18 + $0x40] sm:$0xff] %v550_v1  ;;  %v528_v4 = vmul.f32 0.5, %v512_v2  ;;  %v493_v5 = vadd.f32 %v1243_v50, %v492_v3 }
 0x172   : > { %v544_v6 = vadd.f32 %v528_v4, %v1196_v14  ;;  %v519_v7 = vmax.f32 %v493_v5, 0.0 }
 0x173   : > { %v477_v9 = vpop.f32.mrf.mxu1 }
 0x174   : > { %560 = vst [vmem:[%s1249_s18 + $0x10] sm:$0xff] %v544_v6  ;;  %v535_v12 = vmul.f32 0.5, %v519_v7  ;;  %v478_v13 = vadd.f32 %v1243_v50, %v477_v9 }
 0x176   : > { %v551_v18 = vadd.f32 %v535_v12, %v1189_v11  ;;  %v513_v19 = vmax.f32 %v478_v13, 0.0 }
 0x177   : > { %v495_v10 = vpop.f32.mrf.mxu3 }
 0x178   : > { %567 = vst [vmem:[%s1249_s18 + $0x48] sm:$0xff] %v551_v18  ;;  %v529_v20 = vmul.f32 0.5, %v513_v19  ;;  %v496_v21 = vadd.f32 %v1243_v50, %v495_v10 }
 0x17a   : > { %v545_v22 = vadd.f32 %v529_v20, %v1199_v15  ;;  %v520_v27 = vmax.f32 %v496_v21, 0.0 }
 0x17b   : > { %v480_v14 = vpop.f32.mrf.mxu1 }
 0x17c   : > { %561 = vst [vmem:[%s1249_s18 + $0x18] sm:$0xff] %v545_v22  ;;  %v536_v28 = vmul.f32 0.5, %v520_v27  ;;  %v481_v29 = vadd.f32 %v1243_v50, %v480_v14 }
 0x17e   : > { %v552_v34 = vadd.f32 %v536_v28, %v1202_v16  ;;  %v514_v35 = vmax.f32 %v481_v29, 0.0 }
 0x17f   : > { %v497_v11 = vpop.f32.mrf.mxu3 }
 0x180   : > { %568 = vst [vmem:[%s1249_s18 + $0x50] sm:$0xff] %v552_v34  ;;  %v530_v36 = vmul.f32 0.5, %v514_v35  ;;  %v498_v37 = vadd.f32 %v1243_v50, %v497_v11 }
 0x182   : > { %v546_v38 = vadd.f32 %v530_v36, %v1212_v23  ;;  %v521_v39 = vmax.f32 %v498_v37, 0.0 }
 0x183   : > { %v482_v15 = vpop.f32.mrf.mxu1 }
 0x184   : > { %562 = vst [vmem:[%s1249_s18 + $0x20] sm:$0xff] %v546_v38  ;;  %v537_v40 = vmul.f32 0.5, %v521_v39  ;;  %v483_v42 = vadd.f32 %v1243_v50, %v482_v15 }
 0x186   : > { %v553_v43 = vadd.f32 %v537_v40, %v1205_v17  ;;  %v515_v44 = vmax.f32 %v483_v42, 0.0 }
 0x187   : > { %v500_v16 = vpop.f32.mrf.mxu3 }
 0x188   : > { %569 = vst [vmem:[%s1249_s18 + $0x58] sm:$0xff] %v553_v43  ;;  %v531_v45 = vmul.f32 0.5, %v515_v44  ;;  %v501_v46 = vadd.f32 %v1243_v50, %v500_v16 }
 0x18a   : > { %v547_v47 = vadd.f32 %v531_v45, %v1215_v24  ;;  %v522_v48 = vmax.f32 %v501_v46, 0.0 }
 0x18b   : > { %v485_v23 = vpop.f32.mrf.mxu1 }
 0x18c   : > { %563 = vst [vmem:[%s1249_s18 + $0x28] sm:$0xff] %v547_v47  ;;  %v538_v49 = vmul.f32 0.5, %v522_v48  ;;  %v486_v51 = vadd.f32 %v1243_v50, %v485_v23 }
 0x18e   : > { %v554_v52 = vadd.f32 %v538_v49, %v1218_v25  ;;  %v516_v53 = vmax.f32 %v486_v51, 0.0 }
 0x18f   : > { %v502_v17 = vpop.f32.mrf.mxu3 }
 0x190   : > { %570 = vst [vmem:[%s1249_s18 + $0x60] sm:$0xff] %v554_v52  ;;  %v532_v54 = vmul.f32 0.5, %v516_v53  ;;  %v503_v55 = vadd.f32 %v1243_v50, %v502_v17 }
 0x192   : > { %v548_v56 = vadd.f32 %v532_v54, %v1228_v30  ;;  %v523_v24 = vmax.f32 %v503_v55, 0.0 }
 0x193   : > { %v487_v41 = vpop.f32.mrf.mxu1 }
 0x194   : > { %564 = vst [vmem:[%s1249_s18 + $0x30] sm:$0xff] %v548_v56  ;;  %v539_v57 = vmul.f32 0.5, %v523_v24  ;;  %v488_v58 = vadd.f32 %v1243_v50, %v487_v41 }
 0x196   : > { %v555_v59 = vadd.f32 %v539_v57, %v1221_v26  ;;  %v517_v25 = vmax.f32 %v488_v58, 0.0 }
 0x197   : > { %v505_v60 = vpop.f32.mrf.mxu3 }
 0x198   : > { %571 = vst [vmem:[%s1249_s18 + $0x68] sm:$0xff] %v555_v59  ;;  %v533_v61 = vmul.f32 0.5, %v517_v25  ;;  %v506_v62 = vadd.f32 %v1243_v50, %v505_v60 }
 0x19a   : > { %v549_v8 = vadd.f32 %v533_v61, %v1231_v31  ;;  %v524_v30 = vmax.f32 %v506_v62, 0.0 }
 0x19c   : > { %565 = vst [vmem:[%s1249_s18 + $0x38] sm:$0xff] %v549_v8  ;;  %v540_v63 = vmul.f32 0.5, %v524_v30 }
 0x19e   : > { %v556_v0 = vadd.f32 %v540_v63, %v1234_v32 }
 0x19f   : > { %v507_v1 = vpop.f32.mrf.mxu3 }
 0x1a0   : > { %572 = vst [vmem:[%s1249_s18 + $0x70] sm:$0xff] %v556_v0  ;;  %v508_v26 = vadd.f32 %v1243_v50, %v507_v1 }
 0x1a2   : > { %v525_v2 = vmax.f32 %v508_v26, 0.0 }
 0x1a4   : > { %v541_v31 = vmul.f32 0.5, %v525_v2 }
 0x1a6   : > { %v557_v3 = vadd.f32 %v541_v31, %v1237_v33 }
 0x1a8   : > { %573 = vst [vmem:[%s1249_s18 + $0x78] sm:$0xff] %v557_v3 }
 0x1a9   : > { %992 = shalt.err (!%p989_p10)
}
 0x1aa   : > { %s1045_s25 = smov 128   ;;  %s1046_s26 = smov 8  }
 0x1ab   : > { %808 = dma.vmem_to_hbm [thread:$0]  (%p1136_p5), %s588_s4, 2048, %s590_s6, %s575_s16, %s1045_s25, %s1045_s25, %s1046_s26  }
 0x1ac PF: > { %s604_s27 = sand.u32 1, %s1023_s12   ;;  %p1340_p12 = scmp.ge.s32.totalorder %s1035_s15, 2 }
 0x1ad   : > { %s605_s5 = scalar_lea.sflag [#allocation4], %s604_s27 }
 0x1ae   : > { %p822_p13 = pnand %p1340_p12, %p1102_p6 }
 0x1b0   : > { %p823_p0 = pneg %p822_p13 }
 0x1b2   : > { %1018 = dma.done.wait (%p823_p0), %s605_s5, 2048  }
 0x1b3   : > { %1020 = vsyncadd (%p823_p0), %s605_s5, 4294965248  ;;  %p17_p3 = scmp.ge.s32.totalorder %s1123_s8, 4   ;;  %s1341_s12 = smov %s1027_s13 }
 0x1b4   : > { %s1342_s13 = smov %s1031_s14  ;;  %s1343_s14 = smov %s1132_s11 }
 0x1b5   : > { %s1344_s15 = smov %s1123_s8  ;;  %19 = sbr.rel (!%p17_p3) target bundleno = 6 (0x6), region = 87 }
 0x1ba   :  { %611 = vsyncpa [#allocation3], 1 }
 0x1bb   :  { %613 = vsyncpa [#allocation3 + $0x1], 1 }
 0x1bc   :  { %614 = vsyncpa [#allocation6], 1 }
 0x1bd   :  { %615 = vsyncpa [#allocation4], 1 }
 0x1be   :  { %617 = vsyncpa [#allocation4 + $0x1], 1 }

// kernel: tpu_custom_call.1
= control target key start
LH: loop header
LB: loop body
LE: loop exit
PB: predicated region body
PF: predicated region fallthrough
CT: control target
= control target key end

     0   :  { %8 = vsyncpa [#allocation3], 0  ;;  %s1331_s0 = inlined_call_operand.hbm [shape: f32[256,128], index: 0, kind: input, shape index: {}]   ;;  %s1332_s1 = inlined_call_operand.hbm [shape: bf16[2,128,128], index: 1, kind: input, shape index: {}]   ;;  %s1333_s2 = inlined_call_operand.hbm [shape: f32[2,1,128], index: 2, kind: input, shape index: {}]   ;;  %s1334_s3 = inlined_call_operand.hbm [shape: f32[256,128], index: 3, kind: output, shape index: {}]  }
   0x1   :  { %10 = vsyncpa [#allocation3 + $0x1], 0 }
   0x2   :  { %11 = vsyncpa [#allocation6], 0 }
   0x3   :  { %12 = vsyncpa [#allocation4], 0 }
   0x4   :  { %14 = vsyncpa [#allocation4 + $0x1], 0  ;;  %s1067_s12 = smov 0   ;;  %s1069_s13 = smov 0  }
   0x5   :  { %s1071_s14 = smov 0   ;;  %s1073_s15 = smov 0  }
   0x6 LB: > { %s1088_s16 = sadd.s32 4294967295, %s1035_s15   ;;  %s682_s17 = sadd.s32 4294967294, %s1035_s15   ;;  %s1035_s15 = sphi %s1073_s15, %s1344_s15   ;;  %s1031_s14 = sphi %s1071_s14, %s1343_s14   ;;  %s1027_s13 = sphi %s1069_s13, %s1342_s13   ;;  %s1023_s12 = sphi %s1067_s12, %s1341_s12  }
   0x7   : > { %p40_p0 = scmp.ne.s32.totalorder %s1027_s13, %s1023_s12  ;;  %p41_p1 = scmp.eq.s32.totalorder %s1088_s16, 0 }
   0x8   : > { %p106_p2 = scmp.eq.s32.totalorder %s1088_s16, 1  ;;  %p112_p3 = scmp.eq.s32.totalorder %s682_s17, 1 }
   0x9   : > { %p1097_p4 = por %p41_p1, %p40_p0  ;;  %p683_p5 = scmp.ge.s32.totalorder %s1035_s15, 1 }
   0xa   : > { %p1102_p6 = por %p112_p3, %p40_p0  ;;  %p119_p7 = scmp.lt.s32.totalorder %s1035_s15, 3 }
   0xb   : > { %s130_s22 = sshll.u32 %s1332_s1, 4  ;;  %s1037_s24 = smov [#allocation5]   ;;  %s131_s22 = int_to_ptr.hbm [resolvable:$true] %s130_s22 }
   0xc   : > { %p1110_p8 = pnand %p683_p5, %p119_p7  ;;  %s132_s25 = sshll.u32 %s1037_s24, 4  ;;  %s133_s25 = int_to_ptr.vmem [resolvable:$true] %s132_s25 }
   0xd   : > { %s144_s28 = sshll.u32 %s1333_s2, 4  ;;  %s1038_s29 = smov 64   ;;  %s145_s28 = int_to_ptr.hbm [resolvable:$true] %s144_s28 }
   0xe   : > { %p810_p9 = pneg %p1110_p8  ;;  %s1039_s30 = smov 4  }
   0xf   : > { %s1040_s4 = smov [#allocation7]   ;;  %s1041_s6 = smov 16  }
  0x10   : > { %p811_p10 = pnand %p810_p9, %p41_p1  ;;  %s146_s5 = sshll.u32 %s1040_s4, 4  ;;  %s147_s5 = int_to_ptr.vmem [resolvable:$true] %s146_s5 }
  0x11   : > { %s1042_s7 = smov 1   ;;  %s1123_s8 = sadd.s32 1, %s1035_s15  }
  0x12   : > { %813 = dma.hbm_to_vmem [thread:$0]  (!%p811_p10), %s131_s22, 2048, %s133_s25, [#allocation6], %s1038_s29, %s1038_s29, %s1039_s30  }
  0x13   : > { %816 = dma.hbm_to_vmem [thread:$0]  (!%p811_p10), %s145_s28, 32, %s147_s5, [#allocation6], %s1041_s6, %s1041_s6, %s1042_s7  }
  0x14   : > { %s24_s9 = ssub.s32 %s1035_s15, %s1123_s8  ;;  %s27_s10 = sadd.s32 1, %s1031_s14 }
  0x15   : > { %p25_p12 = scmp.eq.s32.totalorder %s24_s9, 0  ;;  %p34_p13 = scmp.ne.s32.totalorder %s1031_s14, %s1027_s13 }
  0x16   : > { %p35_p0 = scmp.eq.s32.totalorder %s1035_s15, 0  ;;  %p827_p7 = scmp.lt.s32.totalorder %s1035_s15, 2 }
  0x17   : > { %s1132_s11 = scalar_select %p25_p12, %s1031_s14, %s27_s10  }
  0x18   : > { %p36_p3 = por %p35_p0, %p34_p13  ;;  %p1136_p5 = por %p106_p2, %p34_p13 }
  0x19   : > { %s160_s20 = sand.u32 1, %s1031_s14   ;;  %s764_s22 = sshll.u32 %s1035_s15, 7 }
  0x1a   : > { %s687_s21 = sshll.u32 %s160_s20, 7  ;;  %s169_s26 = scalar_lea.hbm %s1331_s0, %s764_s22 }
  0x1b   : > { %s164_s27 = scalar_lea.vmem [#allocation2], %s687_s21  ;;  %s170_s29 = sshll.u32 %s169_s26, 4  ;;  %s171_s29 = int_to_ptr.hbm [resolvable:$true] %s170_s29 }
  0x1c   : > { %s172_s28 = sshll.u32 %s164_s27, 4  ;;  %p1146_p9 = pnand %p827_p7, %p36_p3  ;;  %s173_s28 = int_to_ptr.vmem [resolvable:$true] %s172_s28 }
  0x1d   : > { %s161_s4 = scalar_lea.sflag [#allocation3], %s160_s20  ;;  %s935_s5 = sshra.s32 %s171_s29, 4  ;;  %s936_s5 = int_to_ptr.hbm [resolvable:$true] %s935_s5 }
  0x1e   : > { %s937_s6 = scalar_lea.hbm %s936_s5, 128  ;;  %p939_p10 = pneg %p1146_p9 }
  0x1f   : > { %p938_p2 = scmp.ne.s32.totalorder %s936_s5, %s937_s6  ;;  %s942_s10 = scalar_lea.hbm %s1331_s0, 256 }
  0x20   : > { %p943_p0 = scmp.lt.s32.totalorder %s936_s5, %s1331_s0  ;;  %p944_p3 = scmp.lt.s32.totalorder %s942_s10, %s937_s6 }
  0x21   : > { %p940_p12 = pnand %p939_p10, %p938_p2 }
  0x22   : > { %p945_p7 = por %p944_p3, %p943_p0 }
  0x23   : > { %p941_p13 = pneg %p940_p12 }
  0x25   : > { %p946_p11 = pnand %p945_p7, %p941_p13 }
  0x27   : > { %949 = shalt.err (!%p946_p11)
}
  0x28   : > { %s1043_s20 = smov 128   ;;  %s1044_s24 = smov 8  }
  0x29   : > { %820 = dma.hbm_to_vmem [thread:$0]  (!%p1146_p9), %s171_s29, 2048, %s173_s28, %s161_s4, %s1043_s20, %s1043_s20, %s1044_s24  }
  0x2a   : > { %184 = sbr.rel (%p1110_p8) target bundleno = 428 (0x1ac), region = 32  ;;  %s1163_s25 = sand.u32 (!%p1110_p8), 1, %s1027_s13  }
  0x2b   : > { %s691_s26 = sshll.u32 (!%p1110_p8), %s1163_s25, 7  ;;  %s187_s27 = scalar_lea.sflag (!%p1110_p8), [#allocation3], %s1163_s25 }
  0x2c   : > { %s1169_s5 = scalar_lea.vmem (!%p1110_p8), [#allocation2], %s691_s26 }
  0x2f   : > { %1010 = dma.done.wait (%p1097_p4), %s187_s27, 2048  }
  0x30   : > { %1012 = vsyncadd (%p1097_p4), %s187_s27, 4294965248 }
  0x31   : > { %1014 = dma.done.wait (%p41_p1), [#allocation6], 2080  }
  0x32   : > { %1016 = vsyncadd (%p41_p1), [#allocation6], 4294965216  ;;  %v772_v0 = vld [vmem:[#allocation5 + $0x38] sm:$0xff]  ;;  %v771_v1 = vld [vmem:[#allocation5 + $0x30] sm:$0xff]  ;;  %s1249_s18 = scalar_lea.vmem [#allocation8], %s691_s26  ;;  %s781_s23 = sshll.u32 %s1088_s16, 7 }
  0x33   : > { %318 = vmatpush.bf16.msra.mxu0 %v772_v0  ;;  %782 = vmatpush.bf16.msra.mxu2 %v772_v0  ;;  %v770_v2 = vld [vmem:[#allocation5 + $0x28] sm:$0xff]  ;;  %v769_v3 = vld [vmem:[#allocation5 + $0x20] sm:$0xff]  ;;  %v768_v4 = vld [vmem:[#allocation5 + $0x18] sm:$0xff]  ;;  %s586_s30 = scalar_lea.hbm %s1334_s3, %s781_s23  ;;  %s587_s4 = sshll.u32 %s1249_s18, 4  ;;  %s588_s4 = int_to_ptr.vmem [resolvable:$true] %s587_s4 }
  0x34   : > { %v767_v5 = vld [vmem:[#allocation5 + $0x10] sm:$0xff]  ;;  %v766_v6 = vld [vmem:[#allocation5 + $0x8] sm:$0xff]  ;;  %v765_v7 = vld [vmem:[#allocation5] sm:$0xff]  ;;  %s589_s6 = sshll.u32 %s586_s30, 4  ;;  %s575_s16 = scalar_lea.sflag [#allocation4], %s1163_s25  ;;  %s590_s6 = int_to_ptr.hbm [resolvable:$true] %s589_s6 }
  0x35   : > { %v1180_v8 = vld [vmem:[%s1169_s5] sm:$0xff]  ;;  %v1183_v9 = vld [vmem:[%s1169_s5 + $0x8] sm:$0xff]  ;;  %v1196_v14 = vld [vmem:[%s1169_s5 + $0x10] sm:$0xff]  ;;  %s979_s7 = sshra.s32 %s590_s6, 4  ;;  %s985_s22 = scalar_lea.hbm %s1334_s3, 256  ;;  %s980_s7 = int_to_ptr.hbm [resolvable:$true] %s979_s7 }
  0x36   : > { %v1186_v10 = vld [vmem:[%s1169_s5 + $0x40] sm:$0xff]  ;;  %v1189_v11 = vld [vmem:[%s1169_s5 + $0x48] sm:$0xff]  ;;  %v242_v12 = vpack.c.bf16 %v1183_v9, %v1180_v8  ;;  %v1199_v15 = vld [vmem:[%s1169_s5 + $0x18] sm:$0xff]  ;;  %s981_s9 = scalar_lea.hbm %s980_s7, 128  ;;  %p986_p11 = scmp.lt.s32.totalorder %s980_s7, %s1334_s3 }
  0x37   : > { %319 = vmatpush.bf16.msra.mxu0 %v771_v1  ;;  %783 = vmatpush.bf16.msra.mxu2 %v771_v1  ;;  %v246_v13 = vpack.c.bf16 %v1189_v11, %v1186_v10  ;;  %v1202_v16 = vld [vmem:[%s1169_s5 + $0x50] sm:$0xff]  ;;  %v1205_v17 = vld [vmem:[%s1169_s5 + $0x58] sm:$0xff]  ;;  %v243_v18 = vpack.c.bf16 %v1199_v15, %v1196_v14  ;;  %v778_v22 = vld [vmem:[#allocation5 + $0x68] sm:$0xff]  ;;  %p982_p1 = scmp.ne.s32.totalorder %s980_s7, %s981_s9  ;;  %p987_p9 = scmp.lt.s32.totalorder %s985_s22, %s981_s9 }
  0x38   : > { %v247_v19 = vpack.c.bf16 %v1205_v17, %v1202_v16  ;;  %v780_v20 = vld [vmem:[#allocation5 + $0x78] sm:$0xff]  ;;  %v779_v21 = vld [vmem:[#allocation5 + $0x70] sm:$0xff]  ;;  %v1212_v23 = vld [vmem:[%s1169_s5 + $0x20] sm:$0xff] }
  0x39   : > { %461 = vmatpush.bf16.msra.mxu1 %v780_v20  ;;  %790 = vmatpush.bf16.msra.mxu3 %v780_v20  ;;  %v1215_v24 = vld [vmem:[%s1169_s5 + $0x28] sm:$0xff]  ;;  %v1218_v25 = vld [vmem:[%s1169_s5 + $0x60] sm:$0xff]  ;;  %v1228_v30 = vld [vmem:[%s1169_s5 + $0x30] sm:$0xff]  ;;  %p983_p4 = pnand %p982_p1, %p1136_p5  ;;  %p988_p2 = por %p987_p9, %p986_p11 }
  0x3a   : > { %v1221_v26 = vld [vmem:[%s1169_s5 + $0x68] sm:$0xff]  ;;  %v777_v27 = vld [vmem:[#allocation5 + $0x60] sm:$0xff]  ;;  %v244_v28 = vpack.c.bf16 %v1215_v24, %v1212_v23  ;;  %v1231_v31 = vld [vmem:[%s1169_s5 + $0x38] sm:$0xff] }
  0x3b   : > { %320 = vmatpush.bf16.msra.mxu0 %v770_v2  ;;  %784 = vmatpush.bf16.msra.mxu2 %v770_v2  ;;  %v248_v29 = vpack.c.bf16 %v1221_v26, %v1218_v25  ;;  %v1234_v32 = vld [vmem:[%s1169_s5 + $0x70] sm:$0xff]  ;;  %v1237_v33 = vld [vmem:[%s1169_s5 + $0x78] sm:$0xff]  ;;  %v245_v34 = vpack.c.bf16 %v1231_v31, %v1228_v30  ;;  %v774_v38 = vld [vmem:[#allocation5 + $0x48] sm:$0xff]  ;;  %p984_p8 = pneg %p983_p4 }
  0x3c   : > { %v249_v35 = vpack.c.bf16 %v1237_v33, %v1234_v32  ;;  %v776_v36 = vld [vmem:[#allocation5 + $0x58] sm:$0xff]  ;;  %v775_v37 = vld [vmem:[#allocation5 + $0x50] sm:$0xff]  ;;  %v773_v39 = vld [vmem:[#allocation5 + $0x40] sm:$0xff] }
  0x3d   : > { %462 = vmatpush.bf16.msra.mxu1 %v779_v21  ;;  %791 = vmatpush.bf16.msra.mxu3 %v779_v21  ;;  %v873_v41 = vld [vmem:[#allocation7] ss:$0 sm:$0xff]  ;;  %p989_p10 = pnand %p988_p2, %p984_p8 }
  0x3f   : > { %321 = vmatpush.bf16.msra.mxu0 %v769_v3  ;;  %785 = vmatpush.bf16.msra.mxu2 %v769_v3 }
  0x41   : > { %463 = vmatpush.bf16.msra.mxu1 %v778_v22  ;;  %792 = vmatpush.bf16.msra.mxu3 %v778_v22 }
  0x43   : > { %322 = vmatpush.bf16.msra.mxu0 %v768_v4  ;;  %786 = vmatpush.bf16.msra.mxu2 %v768_v4 }
  0x45   : > { %464 = vmatpush.bf16.msra.mxu1 %v777_v27  ;;  %793 = vmatpush.bf16.msra.mxu3 %v777_v27 }
  0x47   : > { %323 = vmatpush.bf16.msra.mxu0 %v767_v5  ;;  %787 = vmatpush.bf16.msra.mxu2 %v767_v5 }
  0x49   : > { %465 = vmatpush.bf16.msra.mxu1 %v776_v36  ;;  %794 = vmatpush.bf16.msra.mxu3 %v776_v36 }
  0x4b   : > { %324 = vmatpush.bf16.msra.mxu0 %v766_v6  ;;  %788 = vmatpush.bf16.msra.mxu2 %v766_v6 }
  0x4d   : > { %466 = vmatpush.bf16.msra.mxu1 %v775_v37  ;;  %795 = vmatpush.bf16.msra.mxu3 %v775_v37 }
  0x4f   : > { %325 = vmatpush.bf16.msra.mxu0 %v765_v7  ;;  %789 = vmatpush.bf16.msra.mxu2 %v765_v7 }
  0x51   : > { %467 = vmatpush.bf16.msra.mxu1 %v774_v38  ;;  %796 = vmatpush.bf16.msra.mxu3 %v774_v38 }
  0x52   : > { %326 = vmatmul.bf16.vlgmr.msra.gmra.mxu0 %v242_v12  ;;  %346 = vmatmul.bf16.vlgmr.msra.gmra.mxu2 %v246_v13 }
  0x55   : > { %468 = vmatpush.bf16.msra.mxu1 %v773_v39  ;;  %797 = vmatpush.bf16.msra.mxu3 %v773_v39 }
  0x62   : > { %331 = vmatmul.bf16.gmra.mxu0 %v243_v18  ;;  %351 = vmatmul.bf16.gmra.mxu2 %v247_v19 }
  0x72   : > { %336 = vmatmul.bf16.gmra.mxu0 %v244_v28  ;;  %356 = vmatmul.bf16.gmra.mxu2 %v248_v29 }
  0x82   : > { %341 = vmatmul.bf16.gmra.mxu0 %v245_v34  ;;  %361 = vmatmul.bf16.gmra.mxu2 %v249_v35 }
  0xcf   : > { %v327_v40 = vpop.f32.mrf.mxu0 }
  0xd0   : > { %v328_v42 = vadd.f32 %v873_v41, %v327_v40 }
  0xd2   : > { %v367_v45 = vmax.f32 %v328_v42, 0.0 }
  0xd5   : > { %v347_v43 = vpop.f32.mrf.mxu2 }
  0xd6   : > { %v348_v48 = vadd.f32 %v873_v41, %v347_v43 }
  0xd7   : > { %v329_v44 = vpop.f32.mrf.mxu0 }
  0xd8   : > { %v330_v46 = vadd.f32 %v873_v41, %v329_v44  ;;  %v375_v53 = vmax.f32 %v348_v48, 0.0 }
  0xda   : > { %v368_v47 = vmax.f32 %v330_v46, 0.0 }
  0xdc   : > { %v383_v49 = vpack.c.bf16 %v368_v47, %v367_v45 }
  0xdd   : > { %v349_v50 = vpop.f32.mrf.mxu2 }
  0xde   : > { %v350_v51 = vadd.f32 %v873_v41, %v349_v50  ;;  %469 = vmatmul.bf16.vlgmr.msra.gmra.mxu1 %v383_v49  ;;  %v1243_v50 = vld [vmem:[#allocation7 + $0x1] ss:$0 sm:$0xff] }
  0xdf   : > { %v332_v52 = vpop.f32.mrf.mxu0 }
  0xe0   : > { %v376_v54 = vmax.f32 %v350_v51, 0.0  ;;  %v333_v56 = vadd.f32 %v873_v41, %v332_v52 }
  0xe2   : > { %v387_v55 = vpack.c.bf16 %v376_v54, %v375_v53  ;;  %v369_v59 = vmax.f32 %v333_v56, 0.0 }
  0xe4   : > { %489 = vmatmul.bf16.vlgmr.msra.gmra.mxu3 %v387_v55 }
  0xe5   : > { %v352_v57 = vpop.f32.mrf.mxu2 }
  0xe6   : > { %v353_v62 = vadd.f32 %v873_v41, %v352_v57 }
  0xe7   : > { %v334_v58 = vpop.f32.mrf.mxu0 }
  0xe8   : > { %v335_v60 = vadd.f32 %v873_v41, %v334_v58  ;;  %v377_v3 = vmax.f32 %v353_v62, 0.0 }
  0xea   : > { %v370_v61 = vmax.f32 %v335_v60, 0.0 }
  0xec   : > { %v384_v63 = vpack.c.bf16 %v370_v61, %v369_v59 }
  0xed   : > { %v354_v0 = vpop.f32.mrf.mxu2 }
  0xee   : > { %v355_v1 = vadd.f32 %v873_v41, %v354_v0  ;;  %474 = vmatmul.bf16.gmra.mxu1 %v384_v63 }
  0xef   : > { %v337_v2 = vpop.f32.mrf.mxu0 }
  0xf0   : > { %v378_v4 = vmax.f32 %v355_v1, 0.0  ;;  %v338_v6 = vadd.f32 %v873_v41, %v337_v2 }
  0xf2   : > { %v388_v5 = vpack.c.bf16 %v378_v4, %v377_v3  ;;  %v371_v13 = vmax.f32 %v338_v6, 0.0 }
  0xf4   : > { %494 = vmatmul.bf16.gmra.mxu3 %v388_v5 }
  0xf5   : > { %v357_v7 = vpop.f32.mrf.mxu2 }
  0xf6   : > { %v358_v20 = vadd.f32 %v873_v41, %v357_v7 }
  0xf7   : > { %v339_v12 = vpop.f32.mrf.mxu0 }
  0xf8   : > { %v340_v18 = vadd.f32 %v873_v41, %v339_v12  ;;  %v379_v29 = vmax.f32 %v358_v20, 0.0 }
  0xfa   : > { %v372_v19 = vmax.f32 %v340_v18, 0.0 }
  0xfc   : > { %v385_v21 = vpack.c.bf16 %v372_v19, %v371_v13 }
  0xfd   : > { %v359_v22 = vpop.f32.mrf.mxu2 }
  0xfe   : > { %v360_v27 = vadd.f32 %v873_v41, %v359_v22  ;;  %479 = vmatmul.bf16.gmra.mxu1 %v385_v21 }
  0xff   : > { %v342_v28 = vpop.f32.mrf.mxu0 }
 0x100   : > { %v380_v34 = vmax.f32 %v360_v27, 0.0  ;;  %v343_v36 = vadd.f32 %v873_v41, %v342_v28 }
 0x102   : > { %v389_v35 = vpack.c.bf16 %v380_v34, %v379_v29  ;;  %v373_v39 = vmax.f32 %v343_v36, 0.0 }
 0x104   : > { %499 = vmatmul.bf16.gmra.mxu3 %v389_v35 }
 0x105   : > { %v362_v37 = vpop.f32.mrf.mxu2 }
 0x106   : > { %v363_v43 = vadd.f32 %v873_v41, %v362_v37 }
 0x107   : > { %v344_v38 = vpop.f32.mrf.mxu0 }
 0x108   : > { %v345_v40 = vadd.f32 %v873_v41, %v344_v38  ;;  %v381_v47 = vmax.f32 %v363_v43, 0.0 }
 0x10a   : > { %v374_v42 = vmax.f32 %v345_v40, 0.0 }
 0x10c   : > { %v386_v44 = vpack.c.bf16 %v374_v42, %v373_v39 }
 0x10d   : > { %v364_v45 = vpop.f32.mrf.mxu2 }
 0x10e   : > { %v365_v46 = vadd.f32 %v873_v41, %v364_v45  ;;  %484 = vmatmul.bf16.gmra.mxu1 %v386_v44 }
 0x110   : > { %v382_v48 = vmax.f32 %v365_v46, 0.0 }
 0x112   : > { %v390_v49 = vpack.c.bf16 %v382_v48, %v381_v47 }
 0x114   : > { %504 = vmatmul.bf16.gmra.mxu3 %v390_v49 }
 0x15b   : > { %v470_v51 = vpop.f32.mrf.mxu1 }
 0x15c   : > { %v471_v52 = vadd.f32 %v1243_v50, %v470_v51 }
 0x15e   : > { %v510_v53 = vmax.f32 %v471_v52, 0.0 }
 0x160   : > { %v526_v54 = vmul.f32 0.5, %v510_v53 }
 0x162   : > { %v542_v55 = vadd.f32 %v526_v54, %v1180_v8 }
 0x163   : > { %v472_v56 = vpop.f32.mrf.mxu1 }
 0x164   : > { %558 = vst [vmem:[%s1249_s18] sm:$0xff] %v542_v55  ;;  %v473_v41 = vadd.f32 %v1243_v50, %v472_v56 }
 0x166   : > { %v511_v57 = vmax.f32 %v473_v41, 0.0 }
 0x167   : > { %v490_v58 = vpop.f32.mrf.mxu3 }
 0x168   : > { %v527_v59 = vmul.f32 0.5, %v511_v57  ;;  %v491_v60 = vadd.f32 %v1243_v50, %v490_v58 }
 0x16a   : > { %v543_v61 = vadd.f32 %v527_v59, %v1183_v9  ;;  %v518_v62 = vmax.f32 %v491_v60, 0.0 }
 0x16b   : > { %v475_v8 = vpop.f32.mrf.mxu1 }
 0x16c   : > { %559 = vst [vmem:[%s1249_s18 + $0x8] sm:$0xff] %v543_v61  ;;  %v534_v63 = vmul.f32 0.5, %v518_v62  ;;  %v476_v0 = vadd.f32 %v1243_v50, %v475_v8 }
 0x16e   : > { %v550_v1 = vadd.f32 %v534_v63, %v1186_v10  ;;  %v512_v2 = vmax.f32 %v476_v0, 0.0 }
 0x16f   : > { %v492_v3 = vpop.f32.mrf.mxu3 }
 0x170   : > { %566 = vst [vmem:[%s1249_s18 + $0x40] sm:$0xff] %v550_v1  ;;  %v528_v4 = vmul.f32 0.5, %v512_v2  ;;  %v493_v5 = vadd.f32 %v1243_v50, %v492_v3 }
 0x172   : > { %v544_v6 = vadd.f32 %v528_v4, %v1196_v14  ;;  %v519_v7 = vmax.f32 %v493_v5, 0.0 }
 0x173   : > { %v477_v9 = vpop.f32.mrf.mxu1 }
 0x174   : > { %560 = vst [vmem:[%s1249_s18 + $0x10] sm:$0xff] %v544_v6  ;;  %v535_v12 = vmul.f32 0.5, %v519_v7  ;;  %v478_v13 = vadd.f32 %v1243_v50, %v477_v9 }
 0x176   : > { %v551_v18 = vadd.f32 %v535_v12, %v1189_v11  ;;  %v513_v19 = vmax.f32 %v478_v13, 0.0 }
 0x177   : > { %v495_v10 = vpop.f32.mrf.mxu3 }
 0x178   : > { %567 = vst [vmem:[%s1249_s18 + $0x48] sm:$0xff] %v551_v18  ;;  %v529_v20 = vmul.f32 0.5, %v513_v19  ;;  %v496_v21 = vadd.f32 %v1243_v50, %v495_v10 }
 0x17a   : > { %v545_v22 = vadd.f32 %v529_v20, %v1199_v15  ;;  %v520_v27 = vmax.f32 %v496_v21, 0.0 }
 0x17b   : > { %v480_v14 = vpop.f32.mrf.mxu1 }
 0x17c   : > { %561 = vst [vmem:[%s1249_s18 + $0x18] sm:$0xff] %v545_v22  ;;  %v536_v28 = vmul.f32 0.5, %v520_v27  ;;  %v481_v29 = vadd.f32 %v1243_v50, %v480_v14 }
 0x17e   : > { %v552_v34 = vadd.f32 %v536_v28, %v1202_v16  ;;  %v514_v35 = vmax.f32 %v481_v29, 0.0 }
 0x17f   : > { %v497_v11 = vpop.f32.mrf.mxu3 }
 0x180   : > { %568 = vst [vmem:[%s1249_s18 + $0x50] sm:$0xff] %v552_v34  ;;  %v530_v36 = vmul.f32 0.5, %v514_v35  ;;  %v498_v37 = vadd.f32 %v1243_v50, %v497_v11 }
 0x182   : > { %v546_v38 = vadd.f32 %v530_v36, %v1212_v23  ;;  %v521_v39 = vmax.f32 %v498_v37, 0.0 }
 0x183   : > { %v482_v15 = vpop.f32.mrf.mxu1 }
 0x184   : > { %562 = vst [vmem:[%s1249_s18 + $0x20] sm:$0xff] %v546_v38  ;;  %v537_v40 = vmul.f32 0.5, %v521_v39  ;;  %v483_v42 = vadd.f32 %v1243_v50, %v482_v15 }
 0x186   : > { %v553_v43 = vadd.f32 %v537_v40, %v1205_v17  ;;  %v515_v44 = vmax.f32 %v483_v42, 0.0 }
 0x187   : > { %v500_v16 = vpop.f32.mrf.mxu3 }
 0x188   : > { %569 = vst [vmem:[%s1249_s18 + $0x58] sm:$0xff] %v553_v43  ;;  %v531_v45 = vmul.f32 0.5, %v515_v44  ;;  %v501_v46 = vadd.f32 %v1243_v50, %v500_v16 }
 0x18a   : > { %v547_v47 = vadd.f32 %v531_v45, %v1215_v24  ;;  %v522_v48 = vmax.f32 %v501_v46, 0.0 }
 0x18b   : > { %v485_v23 = vpop.f32.mrf.mxu1 }
 0x18c   : > { %563 = vst [vmem:[%s1249_s18 + $0x28] sm:$0xff] %v547_v47  ;;  %v538_v49 = vmul.f32 0.5, %v522_v48  ;;  %v486_v51 = vadd.f32 %v1243_v50, %v485_v23 }
 0x18e   : > { %v554_v52 = vadd.f32 %v538_v49, %v1218_v25  ;;  %v516_v53 = vmax.f32 %v486_v51, 0.0 }
 0x18f   : > { %v502_v17 = vpop.f32.mrf.mxu3 }
 0x190   : > { %570 = vst [vmem:[%s1249_s18 + $0x60] sm:$0xff] %v554_v52  ;;  %v532_v54 = vmul.f32 0.5, %v516_v53  ;;  %v503_v55 = vadd.f32 %v1243_v50, %v502_v17 }
 0x192   : > { %v548_v56 = vadd.f32 %v532_v54, %v1228_v30  ;;  %v523_v24 = vmax.f32 %v503_v55, 0.0 }
 0x193   : > { %v487_v41 = vpop.f32.mrf.mxu1 }
 0x194   : > { %564 = vst [vmem:[%s1249_s18 + $0x30] sm:$0xff] %v548_v56  ;;  %v539_v57 = vmul.f32 0.5, %v523_v24  ;;  %v488_v58 = vadd.f32 %v1243_v50, %v487_v41 }
 0x196   : > { %v555_v59 = vadd.f32 %v539_v57, %v1221_v26  ;;  %v517_v25 = vmax.f32 %v488_v58, 0.0 }
 0x197   : > { %v505_v60 = vpop.f32.mrf.mxu3 }
 0x198   : > { %571 = vst [vmem:[%s1249_s18 + $0x68] sm:$0xff] %v555_v59  ;;  %v533_v61 = vmul.f32 0.5, %v517_v25  ;;  %v506_v62 = vadd.f32 %v1243_v50, %v505_v60 }
 0x19a   : > { %v549_v8 = vadd.f32 %v533_v61, %v1231_v31  ;;  %v524_v30 = vmax.f32 %v506_v62, 0.0 }
 0x19c   : > { %565 = vst [vmem:[%s1249_s18 + $0x38] sm:$0xff] %v549_v8  ;;  %v540_v63 = vmul.f32 0.5, %v524_v30 }
 0x19e   : > { %v556_v0 = vadd.f32 %v540_v63, %v1234_v32 }
 0x19f   : > { %v507_v1 = vpop.f32.mrf.mxu3 }
 0x1a0   : > { %572 = vst [vmem:[%s1249_s18 + $0x70] sm:$0xff] %v556_v0  ;;  %v508_v26 = vadd.f32 %v1243_v50, %v507_v1 }
 0x1a2   : > { %v525_v2 = vmax.f32 %v508_v26, 0.0 }
 0x1a4   : > { %v541_v31 = vmul.f32 0.5, %v525_v2 }
 0x1a6   : > { %v557_v3 = vadd.f32 %v541_v31, %v1237_v33 }
 0x1a8   : > { %573 = vst [vmem:[%s1249_s18 + $0x78] sm:$0xff] %v557_v3 }
 0x1a9   : > { %992 = shalt.err (!%p989_p10)
}
 0x1aa   : > { %s1045_s25 = smov 128   ;;  %s1046_s26 = smov 8  }
 0x1ab   : > { %808 = dma.vmem_to_hbm [thread:$0]  (%p1136_p5), %s588_s4, 2048, %s590_s6, %s575_s16, %s1045_s25, %s1045_s25, %s1046_s26  }
 0x1ac PF: > { %s604_s27 = sand.u32 1, %s1023_s12   ;;  %p1340_p12 = scmp.ge.s32.totalorder %s1035_s15, 2 }
 0x1ad   : > { %s605_s5 = scalar_lea.sflag [#allocation4], %s604_s27 }
 0x1ae   : > { %p822_p13 = pnand %p1340_p12, %p1102_p6 }
 0x1b0   : > { %p823_p0 = pneg %p822_p13 }
 0x1b2   : > { %1018 = dma.done.wait (%p823_p0), %s605_s5, 2048  }
 0x1b3   : > { %1020 = vsyncadd (%p823_p0), %s605_s5, 4294965248  ;;  %p17_p3 = scmp.ge.s32.totalorder %s1123_s8, 4   ;;  %s1341_s12 = smov %s1027_s13 }
 0x1b4   : > { %s1342_s13 = smov %s1031_s14  ;;  %s1343_s14 = smov %s1132_s11 }
 0x1b5   : > { %s1344_s15 = smov %s1123_s8  ;;  %19 = sbr.rel (!%p17_p3) target bundleno = 6 (0x6), region = 87 }
 0x1ba   :  { %611 = vsyncpa [#allocation3], 1 }
 0x1bb   :  { %613 = vsyncpa [#allocation3 + $0x1], 1 }
 0x1bc   :  { %614 = vsyncpa [#allocation6], 1 }
 0x1bd   :  { %615 = vsyncpa [#allocation4], 1 }
 0x1be   :  { %617 = vsyncpa [#allocation4 + $0x1], 1 }

</bundles_post_ra>
